<compile_context>
chip_gen: v7x
topology: tpu7x:2x2x1
jax: 0.10.0
libtpu: 0.0.40
codegen_flags: <defaults>
</compile_context>

<pallas_src>
import functools

import jax
import jax.numpy as jnp
from jax.experimental import pallas as pl
from jax.experimental.pallas import tpu as pltpu


def _round_up(n, m):
    return ((n + m - 1) // m) * m


# ----------------------------------------------------------------------------
# Fused kernel: one MC sample of a 2-layer mean-field Bayesian MLP.
#   W_l = mu_l + sigma_l * eps_l      (sigma = softplus(rho) precomputed)
#   h   = relu(x @ W1 + b1)           (kept as a value, no VMEM round-trip)
#   y   = h @ W2 + b2
# Grid axis 0 = MC sample index ("parallel").
# ----------------------------------------------------------------------------
def _fused_bnn_kernel(x_ref,
                      w1mu_ref, w1sig_ref, b1mu_ref, b1sig_ref,
                      w2mu_ref, w2sig_ref, b2mu_ref, b2sig_ref,
                      ew1_ref, eb1_ref, ew2_ref, eb2_ref,
                      o_ref):
    # Reparameterization.  softplus(rho) was hoisted to the wrapper, so the
    # kernel's per-sample elementwise work is only mu + sigma * eps.  Keep the
    # elementwise math in f32 (correct on all generations; v5e has no bf16
    # VPU/EUP); cast to bf16 only to feed the MXU.
    w1 = (w1mu_ref[...] + w1sig_ref[...] * ew1_ref[...]).astype(jnp.bfloat16)
    b1 = b1mu_ref[...] + b1sig_ref[...] * eb1_ref[...]
    w2 = (w2mu_ref[...] + w2sig_ref[...] * ew2_ref[...]).astype(jnp.bfloat16)
    b2 = b2mu_ref[...] + b2sig_ref[...] * eb2_ref[...]

    # Layer 1: h = relu(x @ W1 + b1).  Padded lanes are ~0 because padded mu
    # is 0 and padded sigma ~ softplus(-30) ~ 1e-13, so no lane mask is needed.
    h = jnp.dot(x_ref[...], w1, preferred_element_type=jnp.float32)
    h = jnp.maximum(h + b1, 0.0)

    # Layer 2: y = h @ W2 + b2.
    y = jnp.dot(h.astype(jnp.bfloat16), w2,
                preferred_element_type=jnp.float32) + b2
    o_ref[...] = y.astype(o_ref.dtype)


@functools.partial(jax.jit, static_argnames=("n_samples", "d_out"))
def fused_bayesian_mlp(x, params, key, *, n_samples, d_out):
    """n_samples MC evaluations of the 2-layer Bayesian MLP in one launch.

    params holds lane-dense-padded f32 arrays: w1_mu/w1_rho (din_p, dhid_p),
    b1_mu/b1_rho (1, dhid_p), w2_mu/w2_rho (dhid_p, dout_p), b2_mu/b2_rho
    (1, dout_p).  Returns (n_samples, B, d_out) float32.
    """
    B, d_in = x.shape
    din_p, dhid_p = params["w1_mu"].shape
    dout_p = params["w2_mu"].shape[1]
    b_pad = _round_up(B, 8)

    # sigma = softplus(rho): once per forward, amortized over all MC samples.
    s_w1 = jax.nn.softplus(params["w1_rho"])
    s_b1 = jax.nn.softplus(params["b1_rho"])
    s_w2 = jax.nn.softplus(params["w2_rho"])
    s_b2 = jax.nn.softplus(params["b2_rho"])

    # Lane-dense padded activations, pre-cast to bf16 (MXU operand dtype).
    x_p = jnp.pad(x, ((0, b_pad - B), (0, din_p - d_in))).astype(jnp.bfloat16)

    # Fresh noise for every MC sample (generated host/XLA-side; works both on
    # real TPUs and in interpret mode).
    kw1, kb1, kw2, kb2 = jax.random.split(key, 4)
    e_w1 = jax.random.normal(kw1, (n_samples, din_p, dhid_p), jnp.float32)
    e_b1 = jax.random.normal(kb1, (n_samples, 1, dhid_p), jnp.float32)
    e_w2 = jax.random.normal(kw2, (n_samples, dhid_p, dout_p), jnp.float32)
    e_b2 = jax.random.normal(kb2, (n_samples, 1, dout_p), jnp.float32)

    def const2d(shape):
        # Same block for every MC sample -> DMA'd once across the grid.
        return pl.BlockSpec(shape, lambda s: (0, 0))

    def per_sample(shape2d):
        # Leading (sample) dim squeezed away; block index follows the grid.
        return pl.BlockSpec((None,) + shape2d, lambda s: (s, 0, 0))

    out = pl.pallas_call(
        _fused_bnn_kernel,
        out_shape=jax.ShapeDtypeStruct((n_samples, b_pad, dout_p), jnp.float32),
        grid=(n_samples,),
        in_specs=[
            const2d((b_pad, din_p)),                                   # x
            const2d((din_p, dhid_p)), const2d((din_p, dhid_p)),        # w1 mu / sigma
            const2d((1, dhid_p)), const2d((1, dhid_p)),                # b1 mu / sigma
            const2d((dhid_p, dout_p)), const2d((dhid_p, dout_p)),      # w2 mu / sigma
            const2d((1, dout_p)), const2d((1, dout_p)),                # b2 mu / sigma
            per_sample((din_p, dhid_p)),                               # eps w1
            per_sample((1, dhid_p)),                                   # eps b1
            per_sample((dhid_p, dout_p)),                              # eps w2
            per_sample((1, dout_p)),                                   # eps b2
        ],
        out_specs=pl.BlockSpec((None, b_pad, dout_p), lambda s: (s, 0, 0)),
        compiler_params=pltpu.CompilerParams(
            # Independent MC samples -> shardable across the 2 TCs on v7x;
            # weight index_maps ignore the axis, so mu/sigma are DMA'd once.
            dimension_semantics=("parallel",)),
    )(x_p,
      params["w1_mu"], s_w1, params["b1_mu"], s_b1,
      params["w2_mu"], s_w2, params["b2_mu"], s_b2,
      e_w1, e_b1, e_w2, e_b2)

    return out[:, :B, :d_out]


def reference_bayesian_mlp(x, params, key, *, n_samples, d_out):
    """Pure-JAX f32 reference using the exact same eps draws as the kernel."""
    B, d_in = x.shape
    din_p, dhid_p = params["w1_mu"].shape
    dout_p = params["w2_mu"].shape[1]
    b_pad = _round_up(B, 8)

    s_w1 = jax.nn.softplus(params["w1_rho"])
    s_b1 = jax.nn.softplus(params["b1_rho"])
    s_w2 = jax.nn.softplus(params["w2_rho"])
    s_b2 = jax.nn.softplus(params["b2_rho"])
    x_p = jnp.pad(x, ((0, b_pad - B), (0, din_p - d_in)))

    kw1, kb1, kw2, kb2 = jax.random.split(key, 4)
    e_w1 = jax.random.normal(kw1, (n_samples, din_p, dhid_p), jnp.float32)
    e_b1 = jax.random.normal(kb1, (n_samples, 1, dhid_p), jnp.float32)
    e_w2 = jax.random.normal(kw2, (n_samples, dhid_p, dout_p), jnp.float32)
    e_b2 = jax.random.normal(kb2, (n_samples, 1, dout_p), jnp.float32)

    outs = []
    for s in range(n_samples):
        w1 = params["w1_mu"] + s_w1 * e_w1[s]
        b1 = params["b1_mu"] + s_b1 * e_b1[s]
        w2 = params["w2_mu"] + s_w2 * e_w2[s]
        b2 = params["b2_mu"] + s_b2 * e_b2[s]
        h = jnp.maximum(x_p @ w1 + b1, 0.0)
        outs.append(h @ w2 + b2)
    return jnp.stack(outs)[:, :B, :d_out]


# ----------------------------------------------------------------------------
# Inner variational module: 2-layer Bayesian MLP (mean-field Gaussian weights),
# parameters stored pre-padded to lane-dense (multiple-of-128) feature dims.
# mu padded with 0, rho padded with -30 so sigma ~ 0 in the padding.
# ----------------------------------------------------------------------------
class VariationalMLP:
    def __init__(self, key, d_in, d_hidden, d_out):
        self.d_in, self.d_hid, self.d_out = d_in, d_hidden, d_out
        din_p = _round_up(d_in, 128)
        dhid_p = _round_up(d_hidden, 128)
        dout_p = _round_up(d_out, 128)
        k1, k2, knoise = jax.random.split(key, 3)

        def pad2(a, rows, cols, value=0.0):
            return jnp.pad(a, ((0, rows - a.shape[0]), (0, cols - a.shape[1])),
                           constant_values=value)

        RHO_PAD = -30.0   # softplus(-30) ~ 1e-13 -> padded weights ~ 0
        self.params = dict(
            w1_mu=pad2(jax.random.normal(k1, (d_in, d_hidden), jnp.float32) * 0.1,
                       din_p, dhid_p),
            w1_rho=pad2(jnp.full((d_in, d_hidden), -3.0, jnp.float32),
                        din_p, dhid_p, RHO_PAD),
            b1_mu=pad2(jnp.zeros((1, d_hidden), jnp.float32), 1, dhid_p),
            b1_rho=pad2(jnp.full((1, d_hidden), -3.0, jnp.float32),
                        1, dhid_p, RHO_PAD),
            w2_mu=pad2(jax.random.normal(k2, (d_hidden, d_out), jnp.float32) * 0.1,
                       dhid_p, dout_p),
            w2_rho=pad2(jnp.full((d_hidden, d_out), -3.0, jnp.float32),
                        dhid_p, dout_p, RHO_PAD),
            b2_mu=pad2(jnp.zeros((1, d_out), jnp.float32), 1, dout_p),
            b2_rho=pad2(jnp.full((1, d_out), -3.0, jnp.float32),
                        1, dout_p, RHO_PAD),
        )
        self.n_batches_per_epoch = None
        self._noise_key = knoise
        self._draws = 0   # counter -> fresh eps every forward call

    # Mirrors nn.Module.modules() for set_regularizing_factor_children.
    def modules(self):
        return [self]

    def set_n_batches_per_epoch(self, n_batches):
        self.n_batches_per_epoch = n_batches

    def __call__(self, x, n_samples=1):
        key = jax.random.fold_in(self._noise_key, self._draws)
        self._draws += 1
        y = fused_bayesian_mlp(x, self.params, key,
                               n_samples=n_samples, d_out=self.d_out)
        return y[0] if n_samples == 1 else y


# ----------------------------------------------------------------------------
# VariationalModel wrapper — identical semantics to the PyTorch class:
# forward(data) = self.module(data); everything else is bookkeeping.
# ----------------------------------------------------------------------------
class VariationalModel:
    def __init__(self, module, n_eval, n_batches_per_epoch):
        self.module = module
        self.n_eval = n_eval
        self.set_regularizing_factor_children(n_batches_per_epoch)
        self.reset_kl_accumulator()

    def set_regularizing_factor_children(self, n_batches):
        for m in getattr(self.module, "modules", lambda: [self.module])():
            if hasattr(m, "set_n_batches_per_epoch"):
                m.set_n_batches_per_epoch(n_batches)

    def reset_kl_accumulator(self):
        # TODO(synk): KL is accumulated by child layers during training in the
        # torch code; the forward pass never touches it, so it stays 0 here.
        self.kl_accumulator = 0

    def forward(self, data):
        return self.module(data)

    __call__ = forward

    def mc_forward(self, data):
        # Amortized n_eval Monte-Carlo evaluation: one kernel launch, weights
        # DMA'd once, sample axis is a "parallel" grid dimension.
        return self.module(data, n_samples=self.n_eval)


if __name__ == "__main__":
    key = jax.random.PRNGKey(0)
    k_data, k_params = jax.random.split(key)

    B, D_IN, D_HID, D_OUT = 8, 32, 64, 16
    x = jax.random.normal(k_data, (B, D_IN), jnp.float32)

    inner = VariationalMLP(k_params, D_IN, D_HID, D_OUT)
    model = VariationalModel(inner, n_eval=4, n_batches_per_epoch=10)

    out = jax.block_until_ready(model(x))            # forward == module(data)
    assert out.shape == (B, D_OUT) and out.dtype == jnp.float32
    assert bool(jnp.all(jnp.isfinite(out)))

    mc = jax.block_until_ready(model.mc_forward(x))  # n_eval samples, one launch
    assert mc.shape == (model.n_eval, B, D_OUT)
    assert bool(jnp.all(jnp.isfinite(mc)))

    # Numerical check against a pure-JAX reference using identical eps draws
    # (loose tolerance because the kernel runs the matmuls in bf16).
    chk_key = jax.random.PRNGKey(123)
    y_k = jax.block_until_ready(
        fused_bayesian_mlp(x, inner.params, chk_key, n_samples=2, d_out=D_OUT))
    y_r = reference_bayesian_mlp(x, inner.params, chk_key, n_samples=2, d_out=D_OUT)
    assert bool(jnp.allclose(y_k, y_r, atol=5e-2, rtol=5e-2))

    print("KERNEL_OK")
</pallas_src>

<mosaic_0001>
module attributes {stable_mosaic.version = 11 : i64} {
  func.func @_fused_bnn_kernel(%arg0: i32, %arg1: memref<8x128xbf16, #tpu.memory_space<vmem>>, %arg2: memref<128x128xf32, #tpu.memory_space<vmem>>, %arg3: memref<128x128xf32, #tpu.memory_space<vmem>>, %arg4: memref<1x128xf32, #tpu.memory_space<vmem>>, %arg5: memref<1x128xf32, #tpu.memory_space<vmem>>, %arg6: memref<128x128xf32, #tpu.memory_space<vmem>>, %arg7: memref<128x128xf32, #tpu.memory_space<vmem>>, %arg8: memref<1x128xf32, #tpu.memory_space<vmem>>, %arg9: memref<1x128xf32, #tpu.memory_space<vmem>>, %arg10: memref<1x128x128xf32, #tpu.memory_space<vmem>>, %arg11: memref<1x1x128xf32, #tpu.memory_space<vmem>>, %arg12: memref<1x128x128xf32, #tpu.memory_space<vmem>>, %arg13: memref<1x1x128xf32, #tpu.memory_space<vmem>>, %arg14: memref<1x8x128xf32, #tpu.memory_space<vmem>>) attributes {dimension_semantics = [#tpu.dimension_semantics<parallel>], iteration_bounds = array<i64: 1>, scalar_prefetch = 0 : i64, scratch_operands = 0 : i64, tpu.core_type = #tpu.core_type<tc>, window_params = [{pipeline_mode = #tpu.pipeline_mode<synchronous>, transform_indices = @transform_0, window_bounds = array<i64: 8, 128>}, {pipeline_mode = #tpu.pipeline_mode<synchronous>, transform_indices = @transform_1, window_bounds = array<i64: 128, 128>}, {pipeline_mode = #tpu.pipeline_mode<synchronous>, transform_indices = @transform_2, window_bounds = array<i64: 128, 128>}, {pipeline_mode = #tpu.pipeline_mode<synchronous>, transform_indices = @transform_3, window_bounds = array<i64: 1, 128>}, {pipeline_mode = #tpu.pipeline_mode<synchronous>, transform_indices = @transform_4, window_bounds = array<i64: 1, 128>}, {pipeline_mode = #tpu.pipeline_mode<synchronous>, transform_indices = @transform_5, window_bounds = array<i64: 128, 128>}, {pipeline_mode = #tpu.pipeline_mode<synchronous>, transform_indices = @transform_6, window_bounds = array<i64: 128, 128>}, {pipeline_mode = #tpu.pipeline_mode<synchronous>, transform_indices = @transform_7, window_bounds = array<i64: 1, 128>}, {pipeline_mode = #tpu.pipeline_mode<synchronous>, transform_indices = @transform_8, window_bounds = array<i64: 1, 128>}, {transform_indices = @transform_9, window_bounds = array<i64: 1, 128, 128>}, {transform_indices = @transform_10, window_bounds = array<i64: 1, 1, 128>}, {transform_indices = @transform_11, window_bounds = array<i64: 1, 128, 128>}, {transform_indices = @transform_12, window_bounds = array<i64: 1, 1, 128>}, {transform_indices = @transform_13, window_bounds = array<i64: 1, 8, 128>}]} {
    %c0 = arith.constant 0 : index
    %c0_0 = arith.constant 0 : index
    %0 = vector.load %arg2[%c0, %c0_0] : memref<128x128xf32, #tpu.memory_space<vmem>>, vector<128x128xf32>
    %c0_1 = arith.constant 0 : index
    %c0_2 = arith.constant 0 : index
    %1 = vector.load %arg3[%c0_1, %c0_2] : memref<128x128xf32, #tpu.memory_space<vmem>>, vector<128x128xf32>
    %c0_3 = arith.constant 0 : index
    %c0_4 = arith.constant 0 : index
    %c0_5 = arith.constant 0 : index
    %2 = vector.load %arg10[%c0_3, %c0_4, %c0_5] : memref<1x128x128xf32, #tpu.memory_space<vmem>>, vector<1x128x128xf32>
    %3 = vector.shape_cast %2 : vector<1x128x128xf32> to vector<128x128xf32>
    %4 = arith.mulf %1, %3 : vector<128x128xf32>
    %5 = arith.addf %0, %4 : vector<128x128xf32>
    %6 = arith.truncf %5 : vector<128x128xf32> to vector<128x128xbf16>
    %c0_6 = arith.constant 0 : index
    %c0_7 = arith.constant 0 : index
    %7 = vector.load %arg4[%c0_6, %c0_7] : memref<1x128xf32, #tpu.memory_space<vmem>>, vector<1x128xf32>
    %c0_8 = arith.constant 0 : index
    %c0_9 = arith.constant 0 : index
    %8 = vector.load %arg5[%c0_8, %c0_9] : memref<1x128xf32, #tpu.memory_space<vmem>>, vector<1x128xf32>
    %c0_10 = arith.constant 0 : index
    %c0_11 = arith.constant 0 : index
    %c0_12 = arith.constant 0 : index
    %9 = vector.load %arg11[%c0_10, %c0_11, %c0_12] : memref<1x1x128xf32, #tpu.memory_space<vmem>>, vector<1x1x128xf32>
    %10 = vector.shape_cast %9 : vector<1x1x128xf32> to vector<1x128xf32>
    %11 = arith.mulf %8, %10 : vector<1x128xf32>
    %12 = arith.addf %7, %11 : vector<1x128xf32>
    %c0_13 = arith.constant 0 : index
    %c0_14 = arith.constant 0 : index
    %13 = vector.load %arg6[%c0_13, %c0_14] : memref<128x128xf32, #tpu.memory_space<vmem>>, vector<128x128xf32>
    %c0_15 = arith.constant 0 : index
    %c0_16 = arith.constant 0 : index
    %14 = vector.load %arg7[%c0_15, %c0_16] : memref<128x128xf32, #tpu.memory_space<vmem>>, vector<128x128xf32>
    %c0_17 = arith.constant 0 : index
    %c0_18 = arith.constant 0 : index
    %c0_19 = arith.constant 0 : index
    %15 = vector.load %arg12[%c0_17, %c0_18, %c0_19] : memref<1x128x128xf32, #tpu.memory_space<vmem>>, vector<1x128x128xf32>
    %16 = vector.shape_cast %15 : vector<1x128x128xf32> to vector<128x128xf32>
    %17 = arith.mulf %14, %16 : vector<128x128xf32>
    %18 = arith.addf %13, %17 : vector<128x128xf32>
    %19 = arith.truncf %18 : vector<128x128xf32> to vector<128x128xbf16>
    %c0_20 = arith.constant 0 : index
    %c0_21 = arith.constant 0 : index
    %20 = vector.load %arg8[%c0_20, %c0_21] : memref<1x128xf32, #tpu.memory_space<vmem>>, vector<1x128xf32>
    %c0_22 = arith.constant 0 : index
    %c0_23 = arith.constant 0 : index
    %21 = vector.load %arg9[%c0_22, %c0_23] : memref<1x128xf32, #tpu.memory_space<vmem>>, vector<1x128xf32>
    %c0_24 = arith.constant 0 : index
    %c0_25 = arith.constant 0 : index
    %c0_26 = arith.constant 0 : index
    %22 = vector.load %arg13[%c0_24, %c0_25, %c0_26] : memref<1x1x128xf32, #tpu.memory_space<vmem>>, vector<1x1x128xf32>
    %23 = vector.shape_cast %22 : vector<1x1x128xf32> to vector<1x128xf32>
    %24 = arith.mulf %21, %23 : vector<1x128xf32>
    %25 = arith.addf %20, %24 : vector<1x128xf32>
    %c0_27 = arith.constant 0 : index
    %c0_28 = arith.constant 0 : index
    %26 = vector.load %arg1[%c0_27, %c0_28] : memref<8x128xbf16, #tpu.memory_space<vmem>>, vector<8x128xbf16>
    %cst = arith.constant dense<0.000000e+00> : vector<8x128xf32>
    %27 = tpu.matmul %26, %6, %cst {dimension_numbers = #tpu.dot_dimension_numbers<[1], [0], [0], [1], [0, 0, 1, 1], [], []>} : vector<8x128xbf16>, vector<128x128xbf16>, vector<8x128xf32> -> vector<8x128xf32>
    %28 = vector.broadcast %12 : vector<1x128xf32> to vector<8x128xf32>
    %29 = arith.addf %27, %28 : vector<8x128xf32>
    %cst_29 = arith.constant 0.000000e+00 : f32
    %30 = vector.broadcast %cst_29 : f32 to vector<8x128xf32>
    %31 = arith.maximumf %29, %30 : vector<8x128xf32>
    %32 = arith.truncf %31 : vector<8x128xf32> to vector<8x128xbf16>
    %cst_30 = arith.constant dense<0.000000e+00> : vector<8x128xf32>
    %33 = tpu.matmul %32, %19, %cst_30 {dimension_numbers = #tpu.dot_dimension_numbers<[1], [0], [0], [1], [0, 0, 1, 1], [], []>} : vector<8x128xbf16>, vector<128x128xbf16>, vector<8x128xf32> -> vector<8x128xf32>
    %34 = vector.broadcast %25 : vector<1x128xf32> to vector<8x128xf32>
    %35 = arith.addf %33, %34 : vector<8x128xf32>
    %c0_31 = arith.constant 0 : index
    %c0_32 = arith.constant 0 : index
    %c0_33 = arith.constant 0 : index
    %36 = vector.load %arg14[%c0_31, %c0_32, %c0_33] : memref<1x8x128xf32, #tpu.memory_space<vmem>>, vector<1x8x128xf32>
    %37 = vector.shape_cast %36 : vector<1x8x128xf32> to vector<8x128xf32>
    %38 = vector.shape_cast %35 : vector<8x128xf32> to vector<1x8x128xf32>
    tpu.vector_store %arg14[%c0_31, %c0_32, %c0_33], %38 {strides = array<i32>} : memref<1x8x128xf32, #tpu.memory_space<vmem>>, vector<1x8x128xf32>,
    return
  }
  func.func @transform_0(%arg0: i32) -> (i32, i32) {
    %c0_i32 = arith.constant 0 : i32
    %c0_i32_0 = arith.constant 0 : i32
    %c0_i32_1 = arith.constant 0 : i32
    return %c0_i32, %c0_i32_0 : i32, i32
  }
  func.func @transform_1(%arg0: i32) -> (i32, i32) {
    %c0_i32 = arith.constant 0 : i32
    %c0_i32_0 = arith.constant 0 : i32
    %c0_i32_1 = arith.constant 0 : i32
    return %c0_i32, %c0_i32_0 : i32, i32
  }
  func.func @transform_2(%arg0: i32) -> (i32, i32) {
    %c0_i32 = arith.constant 0 : i32
    %c0_i32_0 = arith.constant 0 : i32
    %c0_i32_1 = arith.constant 0 : i32
    return %c0_i32, %c0_i32_0 : i32, i32
  }
  func.func @transform_3(%arg0: i32) -> (i32, i32) {
    %c0_i32 = arith.constant 0 : i32
    %c0_i32_0 = arith.constant 0 : i32
    %c0_i32_1 = arith.constant 0 : i32
    return %c0_i32, %c0_i32_0 : i32, i32
  }
  func.func @transform_4(%arg0: i32) -> (i32, i32) {
    %c0_i32 = arith.constant 0 : i32
    %c0_i32_0 = arith.constant 0 : i32
    %c0_i32_1 = arith.constant 0 : i32
    return %c0_i32, %c0_i32_0 : i32, i32
  }
  func.func @transform_5(%arg0: i32) -> (i32, i32) {
    %c0_i32 = arith.constant 0 : i32
    %c0_i32_0 = arith.constant 0 : i32
    %c0_i32_1 = arith.constant 0 : i32
    return %c0_i32, %c0_i32_0 : i32, i32
  }
  func.func @transform_6(%arg0: i32) -> (i32, i32) {
    %c0_i32 = arith.constant 0 : i32
    %c0_i32_0 = arith.constant 0 : i32
    %c0_i32_1 = arith.constant 0 : i32
    return %c0_i32, %c0_i32_0 : i32, i32
  }
  func.func @transform_7(%arg0: i32) -> (i32, i32) {
    %c0_i32 = arith.constant 0 : i32
    %c0_i32_0 = arith.constant 0 : i32
    %c0_i32_1 = arith.constant 0 : i32
    return %c0_i32, %c0_i32_0 : i32, i32
  }
  func.func @transform_8(%arg0: i32) -> (i32, i32) {
    %c0_i32 = arith.constant 0 : i32
    %c0_i32_0 = arith.constant 0 : i32
    %c0_i32_1 = arith.constant 0 : i32
    return %c0_i32, %c0_i32_0 : i32, i32
  }
  func.func @transform_9(%arg0: i32) -> (i32, i32, i32) {
    %c0_i32 = arith.constant 0 : i32
    %c0_i32_0 = arith.constant 0 : i32
    %c0_i32_1 = arith.constant 0 : i32
    return %arg0, %c0_i32, %c0_i32_0 : i32, i32, i32
  }
  func.func @transform_10(%arg0: i32) -> (i32, i32, i32) {
    %c0_i32 = arith.constant 0 : i32
    %c0_i32_0 = arith.constant 0 : i32
    %c0_i32_1 = arith.constant 0 : i32
    return %arg0, %c0_i32, %c0_i32_0 : i32, i32, i32
  }
  func.func @transform_11(%arg0: i32) -> (i32, i32, i32) {
    %c0_i32 = arith.constant 0 : i32
    %c0_i32_0 = arith.constant 0 : i32
    %c0_i32_1 = arith.constant 0 : i32
    return %arg0, %c0_i32, %c0_i32_0 : i32, i32, i32
  }
  func.func @transform_12(%arg0: i32) -> (i32, i32, i32) {
    %c0_i32 = arith.constant 0 : i32
    %c0_i32_0 = arith.constant 0 : i32
    %c0_i32_1 = arith.constant 0 : i32
    return %arg0, %c0_i32, %c0_i32_0 : i32, i32, i32
  }
  func.func @transform_13(%arg0: i32) -> (i32, i32, i32) {
    %c0_i32 = arith.constant 0 : i32
    %c0_i32_0 = arith.constant 0 : i32
    %c0_i32_1 = arith.constant 0 : i32
    return %arg0, %c0_i32, %c0_i32_0 : i32, i32, i32
  }
}

</mosaic_0001>

<bundles_post_ra>
// kernel: fused_bayesian_mlp.3
= control target key start
LH: loop header
LB: loop body
LE: loop exit
PB: predicated region body
PF: predicated region fallthrough
CT: control target
= control target key end

     0   :  { %v427_v3 = vmov 0.0   ;;  %vm428_vm0 = vmmov 0   ;;  %s839_s0 = inlined_call_operand.vmem [shape: bf16[8,128], index: 0, kind: input, shape index: {}]   ;;  %s840_s1 = inlined_call_operand.vmem [shape: f32[128,128], index: 1, kind: input, shape index: {}]   ;;  %s841_s2 = inlined_call_operand.vmem [shape: f32[128,128], index: 2, kind: input, shape index: {}]   ;;  %s842_s3 = inlined_call_operand.vmem [shape: f32[1,128], index: 3, kind: input, shape index: {}]   ;;  %s843_s4 = inlined_call_operand.vmem [shape: f32[1,128], index: 4, kind: input, shape index: {}]   ;;  %s844_s5 = inlined_call_operand.vmem [shape: f32[128,128], index: 5, kind: input, shape index: {}]   ;;  %s845_s6 = inlined_call_operand.vmem [shape: f32[128,128], index: 6, kind: input, shape index: {}]   ;;  %s846_s7 = inlined_call_operand.vmem [shape: f32[1,128], index: 7, kind: input, shape index: {}]   ;;  %s847_s8 = inlined_call_operand.vmem [shape: f32[1,128], index: 8, kind: input, shape index: {}]   ;;  %s848_s9 = inlined_call_operand.vmem [shape: f32[1,128,128], index: 9, kind: input, shape index: {}]   ;;  %s849_s10 = inlined_call_operand.vmem [shape: f32[1,1,128], index: 10, kind: input, shape index: {}]   ;;  %s850_s11 = inlined_call_operand.vmem [shape: f32[1,128,128], index: 11, kind: input, shape index: {}]   ;;  %s851_s12 = inlined_call_operand.vmem [shape: f32[1,1,128], index: 12, kind: input, shape index: {}]   ;;  %s852_s13 = inlined_call_operand.hbm [shape: f32[1,8,128], index: 13, kind: output, shape index: {}]  }
   0x1   :  { %v46_v0 = vld [vmem:[%s840_s1] sm:$0xff]  ;;  %v47_v1 = vld [vmem:[%s840_s1 + $0x8] sm:$0xff]  ;;  %360 = vmatprep.subr.bf16.mxu0 %v427_v3  ;;  %376 = vmatprep.mubr.msk.bf16.mxu0 %vm428_vm0, %v427_v3  ;;  %v48_v9 = vld [vmem:[%s840_s1 + $0x10] sm:$0xff] }
   0x2   :  { %v62_v2 = vld [vmem:[%s841_s2] sm:$0xff]  ;;  %v63_v4 = vld [vmem:[%s841_s2 + $0x8] sm:$0xff]  ;;  %v49_v10 = vld [vmem:[%s840_s1 + $0x18] sm:$0xff]  ;;  %380 = vmatprep.subr.bf16.mxu1 %v427_v3  ;;  %396 = vmatprep.mubr.msk.bf16.mxu1 %vm428_vm0, %v427_v3 }
   0x3   :  { %v78_v5 = vld [vmem:[%s848_s9] sm:$0xff]  ;;  %v79_v6 = vld [vmem:[%s848_s9 + $0x8] sm:$0xff]  ;;  %v64_v11 = vld [vmem:[%s841_s2 + $0x10] sm:$0xff] }
   0x4   :  { %v94_v7 = vmul.f32 %v78_v5, %v62_v2  ;;  %v95_v8 = vmul.f32 %v79_v6, %v63_v4  ;;  %v65_v12 = vld [vmem:[%s841_s2 + $0x18] sm:$0xff]  ;;  %v80_v13 = vld [vmem:[%s848_s9 + $0x10] sm:$0xff]  ;;  %v50_v19 = vld [vmem:[%s840_s1 + $0x20] sm:$0xff] }
   0x5   :  { %v81_v14 = vld [vmem:[%s848_s9 + $0x18] sm:$0xff]  ;;  %v96_v17 = vmul.f32 %v80_v13, %v64_v11  ;;  %v66_v20 = vld [vmem:[%s841_s2 + $0x20] sm:$0xff]  ;;  %v67_v21 = vld [vmem:[%s841_s2 + $0x28] sm:$0xff] }
   0x6   :  { %v110_v15 = vadd.f32 %v94_v7, %v46_v0  ;;  %v111_v16 = vadd.f32 %v95_v8, %v47_v1  ;;  %v97_v18 = vmul.f32 %v81_v14, %v65_v12  ;;  %v82_v22 = vld [vmem:[%s848_s9 + $0x20] sm:$0xff]  ;;  %v83_v23 = vld [vmem:[%s848_s9 + $0x28] sm:$0xff]  ;;  %v68_v29 = vld [vmem:[%s841_s2 + $0x30] sm:$0xff] }
   0x7   :  { %v112_v25 = vadd.f32 %v96_v17, %v48_v9  ;;  %v51_v27 = vld [vmem:[%s840_s1 + $0x28] sm:$0xff]  ;;  %v98_v28 = vmul.f32 %v82_v22, %v66_v20  ;;  %v99_v30 = vmul.f32 %v83_v23, %v67_v21  ;;  %v69_v31 = vld [vmem:[%s841_s2 + $0x38] sm:$0xff]  ;;  %v84_v32 = vld [vmem:[%s848_s9 + $0x30] sm:$0xff] }
   0x8   :  { %v126_v24 = vpack.c.bf16 %v111_v16, %v110_v15  ;;  %v113_v26 = vadd.f32 %v97_v18, %v49_v10  ;;  %v85_v33 = vld [vmem:[%s848_s9 + $0x38] sm:$0xff]  ;;  %v52_v36 = vld [vmem:[%s840_s1 + $0x30] sm:$0xff]  ;;  %v100_v38 = vmul.f32 %v84_v32, %v68_v29  ;;  %v70_v40 = vld [vmem:[%s841_s2 + $0x40] sm:$0xff] }
   0x9   :  { %v114_v35 = vadd.f32 %v98_v28, %v50_v19  ;;  %v53_v37 = vld [vmem:[%s840_s1 + $0x38] sm:$0xff]  ;;  %v101_v39 = vmul.f32 %v85_v33, %v69_v31  ;;  %v115_v41 = vadd.f32 %v99_v30, %v51_v27  ;;  %v71_v42 = vld [vmem:[%s841_s2 + $0x48] sm:$0xff]  ;;  %v86_v43 = vld [vmem:[%s848_s9 + $0x40] sm:$0xff] }
   0xa   :  { %361 = vmatpush3.bf16.msra.mxu0 %v126_v24  ;;  %v127_v34 = vpack.c.bf16 %v113_v26, %v112_v25  ;;  %v87_v44 = vld [vmem:[%s848_s9 + $0x48] sm:$0xff]  ;;  %v102_v45 = vmul.f32 %v86_v43, %v70_v40  ;;  %v116_v48 = vadd.f32 %v100_v38, %v52_v36  ;;  %v54_v50 = vld [vmem:[%s840_s1 + $0x40] sm:$0xff]  ;;  %v72_v52 = vld [vmem:[%s841_s2 + $0x50] sm:$0xff] }
   0xb   :  { %362 = vmatprep.subr.bf16.mxu0 %v427_v3  ;;  %v103_v46 = vmul.f32 %v87_v44, %v71_v42  ;;  %v128_v47 = vpack.c.bf16 %v115_v41, %v114_v35  ;;  %v117_v49 = vadd.f32 %v101_v39, %v53_v37  ;;  %v55_v51 = vld [vmem:[%s840_s1 + $0x48] sm:$0xff]  ;;  %v73_v53 = vld [vmem:[%s841_s2 + $0x58] sm:$0xff]  ;;  %v88_v54 = vld [vmem:[%s848_s9 + $0x50] sm:$0xff] }
   0xc   :  { %v89_v55 = vld [vmem:[%s848_s9 + $0x58] sm:$0xff]  ;;  %v74_v56 = vld [vmem:[%s841_s2 + $0x60] sm:$0xff]  ;;  %v118_v57 = vadd.f32 %v102_v45, %v54_v50  ;;  %v75_v59 = vld [vmem:[%s841_s2 + $0x68] sm:$0xff]  ;;  %v104_v1 = vmul.f32 %v88_v54, %v72_v52 }
   0xd   :  { %v119_v58 = vadd.f32 %v103_v46, %v55_v51  ;;  %v90_v60 = vld [vmem:[%s848_s9 + $0x60] sm:$0xff]  ;;  %v91_v61 = vld [vmem:[%s848_s9 + $0x68] sm:$0xff]  ;;  %v129_v62 = vpack.c.bf16 %v117_v49, %v116_v48  ;;  %v56_v63 = vld [vmem:[%s840_s1 + $0x50] sm:$0xff]  ;;  %v105_v2 = vmul.f32 %v89_v55, %v73_v53 }
   0xe   :  { %363 = vmatpush3.bf16.msra.mxu0 %v127_v34  ;;  %v57_v0 = vld [vmem:[%s840_s1 + $0x58] sm:$0xff]  ;;  %v139_v4 = vld [vmem:[%s844_s5] sm:$0xff]  ;;  %v59_v6 = vld [vmem:[%s840_s1 + $0x68] sm:$0xff]  ;;  %v106_v10 = vmul.f32 %v90_v60, %v74_v56  ;;  %v107_v11 = vmul.f32 %v91_v61, %v75_v59  ;;  %v120_v25 = vadd.f32 %v104_v1, %v56_v63 }
   0xf   :  { %364 = vmatprep.subr.bf16.mxu0 %v427_v3  ;;  %v58_v5 = vld [vmem:[%s840_s1 + $0x60] sm:$0xff]  ;;  %v156_v8 = vld [vmem:[%s845_s6 + $0x8] sm:$0xff]  ;;  %v76_v12 = vld [vmem:[%s841_s2 + $0x70] sm:$0xff]  ;;  %v130_v18 = vpack.c.bf16 %v119_v58, %v118_v57  ;;  %v121_v26 = vadd.f32 %v105_v2, %v57_v0 }
  0x10   :  { %v155_v7 = vld [vmem:[%s845_s6] sm:$0xff]  ;;  %v92_v13 = vld [vmem:[%s848_s9 + $0x70] sm:$0xff]  ;;  %v140_v14 = vld [vmem:[%s844_s5 + $0x8] sm:$0xff]  ;;  %v122_v37 = vadd.f32 %v106_v10, %v58_v5  ;;  %v123_v38 = vadd.f32 %v107_v11, %v59_v6 }
  0x11   :  { %v171_v9 = vld [vmem:[%s850_s11] sm:$0xff]  ;;  %v172_v15 = vld [vmem:[%s850_s11 + $0x8] sm:$0xff]  ;;  %v141_v17 = vld [vmem:[%s844_s5 + $0x10] sm:$0xff]  ;;  %v108_v43 = vmul.f32 %v92_v13, %v76_v12  ;;  %v131_v50 = vpack.c.bf16 %v121_v26, %v120_v25 }
  0x12   :  { %365 = vmatpush3.bf16.msra.mxu0 %v128_v47  ;;  %v187_v16 = vmul.f32 %v171_v9, %v155_v7  ;;  %v77_v19 = vld [vmem:[%s841_s2 + $0x78] sm:$0xff]  ;;  %v188_v21 = vmul.f32 %v172_v15, %v156_v8  ;;  %v157_v22 = vld [vmem:[%s845_s6 + $0x10] sm:$0xff]  ;;  %v143_v31 = vld [vmem:[%s844_s5 + $0x20] sm:$0xff]  ;;  %v132_v2 = vpack.c.bf16 %v123_v38, %v122_v37 }
  0x13   :  { %366 = vmatprep.subr.bf16.mxu0 %v427_v3  ;;  %v93_v20 = vld [vmem:[%s848_s9 + $0x78] sm:$0xff]  ;;  %v173_v24 = vld [vmem:[%s850_s11 + $0x10] sm:$0xff]  ;;  %v159_v34 = vld [vmem:[%s845_s6 + $0x20] sm:$0xff] }
  0x14   :  { %v158_v23 = vld [vmem:[%s845_s6 + $0x18] sm:$0xff]  ;;  %v203_v27 = vadd.f32 %v187_v16, %v139_v4  ;;  %v189_v30 = vmul.f32 %v173_v24, %v157_v22  ;;  %v204_v32 = vadd.f32 %v188_v21, %v140_v14  ;;  %v160_v35 = vld [vmem:[%s845_s6 + $0x28] sm:$0xff]  ;;  %v175_v36 = vld [vmem:[%s850_s11 + $0x20] sm:$0xff]  ;;  %v109_v53 = vmul.f32 %v93_v20, %v77_v19 }
  0x15   :  { %v142_v28 = vld [vmem:[%s844_s5 + $0x18] sm:$0xff]  ;;  %v144_v40 = vld [vmem:[%s844_s5 + $0x28] sm:$0xff]  ;;  %v191_v42 = vmul.f32 %v175_v36, %v159_v34  ;;  %v161_v47 = vld [vmem:[%s845_s6 + $0x30] sm:$0xff] }
  0x16   :  { %367 = vmatpush3.bf16.msra.mxu0 %v129_v62  ;;  %v174_v29 = vld [vmem:[%s850_s11 + $0x18] sm:$0xff]  ;;  %v205_v39 = vadd.f32 %v189_v30, %v141_v17  ;;  %v176_v41 = vld [vmem:[%s850_s11 + $0x28] sm:$0xff]  ;;  %v219_v44 = vpack.c.bf16 %v204_v32, %v203_v27  ;;  %v177_v49 = vld [vmem:[%s850_s11 + $0x30] sm:$0xff] }
  0x17   :  { %368 = vmatprep.subr.bf16.mxu0 %v427_v3  ;;  %v190_v33 = vmul.f32 %v174_v29, %v158_v23  ;;  %v192_v46 = vmul.f32 %v176_v41, %v160_v35  ;;  %v162_v48 = vld [vmem:[%s845_s6 + $0x38] sm:$0xff]  ;;  %v60_v51 = vld [vmem:[%s840_s1 + $0x70] sm:$0xff]  ;;  %v207_v54 = vadd.f32 %v191_v42, %v143_v31  ;;  %v193_v56 = vmul.f32 %v177_v49, %v161_v47  ;;  %v163_v61 = vld [vmem:[%s845_s6 + $0x40] sm:$0xff] }
  0x18   :  { %v61_v52 = vld [vmem:[%s840_s1 + $0x78] sm:$0xff]  ;;  %381 = vmatpush3.bf16.msra.mxu1 %v219_v44  ;;  %v145_v59 = vld [vmem:[%s844_s5 + $0x30] sm:$0xff]  ;;  %v179_v62 = vld [vmem:[%s850_s11 + $0x40] sm:$0xff]  ;;  %v124_v4 = vadd.f32 %v108_v43, %v60_v51 }
  0x19   :  { %v206_v45 = vadd.f32 %v190_v33, %v142_v28  ;;  %v178_v55 = vld [vmem:[%s850_s11 + $0x38] sm:$0xff]  ;;  %v208_v58 = vadd.f32 %v192_v46, %v144_v40  ;;  %382 = vmatprep.subr.bf16.mxu1 %v427_v3  ;;  %v164_v0 = vld [vmem:[%s845_s6 + $0x48] sm:$0xff]  ;;  %v125_v5 = vadd.f32 %v109_v53, %v61_v52  ;;  %v209_v6 = vadd.f32 %v193_v56, %v145_v59  ;;  %v147_v7 = vld [vmem:[%s844_s5 + $0x40] sm:$0xff] }
  0x1a   :  { %369 = vmatpush3.bf16.msra.mxu0 %v130_v18  ;;  %v194_v60 = vmul.f32 %v178_v55, %v162_v48  ;;  %v146_v63 = vld [vmem:[%s844_s5 + $0x38] sm:$0xff]  ;;  %v180_v1 = vld [vmem:[%s850_s11 + $0x48] sm:$0xff]  ;;  %v195_v8 = vmul.f32 %v179_v62, %v163_v61  ;;  %v165_v12 = vld [vmem:[%s845_s6 + $0x50] sm:$0xff] }
  0x1b   :  { %370 = vmatprep.subr.bf16.mxu0 %v427_v3  ;;  %v220_v57 = vpack.c.bf16 %v206_v45, %v205_v39  ;;  %v221_v9 = vpack.c.bf16 %v208_v58, %v207_v54  ;;  %v196_v11 = vmul.f32 %v180_v1, %v164_v0  ;;  %v181_v13 = vld [vmem:[%s850_s11 + $0x50] sm:$0xff] }
  0x1c   :  { %v210_v10 = vadd.f32 %v194_v60, %v146_v63 }
  0x1d   :  { %383 = vmatpush3.bf16.msra.mxu1 %v220_v57 }
  0x1e   :  { %371 = vmatpush3.bf16.msra.mxu0 %v131_v50 }
  0x1f   :  { %372 = vmatprep.subr.bf16.mxu0 %v427_v3 }
  0x20   :  { %18 = vsyncpa [#allocation3], 0  ;;  %384 = vmatprep.subr.bf16.mxu1 %v427_v3  ;;  %v148_v14 = vld [vmem:[%s844_s5 + $0x48] sm:$0xff]  ;;  %v166_v15 = vld [vmem:[%s845_s6 + $0x58] sm:$0xff]  ;;  %v133_v17 = vpack.c.bf16 %v125_v5, %v124_v4  ;;  %v211_v18 = vadd.f32 %v195_v8, %v147_v7  ;;  %v197_v19 = vmul.f32 %v181_v13, %v165_v12  ;;  %v222_v20 = vpack.c.bf16 %v210_v10, %v209_v6  ;;  %s429_s23 = smov [#allocation2]  }
  0x21   :  { %v182_v16 = vld [vmem:[%s850_s11 + $0x58] sm:$0xff]  ;;  %385 = vmatpush3.bf16.msra.mxu1 %v221_v9  ;;  %v212_v21 = vadd.f32 %v196_v11, %v148_v14  ;;  %v149_v23 = vld [vmem:[%s844_s5 + $0x50] sm:$0xff]  ;;  %v232_v25 = vld [vmem:[%s839_s0] sm:$0xf]  ;;  %v234_v52 = vlaneseq  ;;  %s334_s24 = sshll.u32 %s429_s23, 4  ;;  %s335_s24 = int_to_ptr.vmem [resolvable:$true] %s334_s24 }
  0x22   :  { %373 = vmatpush3.bf16.msra.mxu0 %v132_v2  ;;  %v198_v22 = vmul.f32 %v182_v16, %v166_v15  ;;  %386 = vmatprep.subr.bf16.mxu1 %v427_v3  ;;  %v150_v24 = vld [vmem:[%s844_s5 + $0x58] sm:$0xff]  ;;  %v213_v27 = vadd.f32 %v197_v19, %v149_v23  ;;  %v167_v30 = vld [vmem:[%s845_s6 + $0x60] sm:$0xff]  ;;  %v168_v31 = vld [vmem:[%s845_s6 + $0x68] sm:$0xff]  ;;  %p408_p1 = scmp.lt.s32.totalorder %s335_s24, %s335_s24 }
  0x23   :  { %374 = vmatprep.subr.bf16.mxu0 %v427_v3  ;;  %v223_v26 = vpack.c.bf16 %v212_v21, %v211_v18  ;;  %v183_v32 = vld [vmem:[%s850_s11 + $0x60] sm:$0xff]  ;;  %v184_v33 = vld [vmem:[%s850_s11 + $0x68] sm:$0xff]  ;;  %v169_v40 = vld [vmem:[%s845_s6 + $0x70] sm:$0xff]  ;;  %v235_v56 = vshrl.u32 %v234_v52, 7 }
  0x24   :  { %v214_v28 = vadd.f32 %v198_v22, %v150_v24  ;;  %v199_v34 = vmul.f32 %v183_v32, %v167_v30  ;;  %v151_v35 = vld [vmem:[%s844_s5 + $0x60] sm:$0xff]  ;;  %v152_v36 = vld [vmem:[%s844_s5 + $0x68] sm:$0xff]  ;;  %v200_v37 = vmul.f32 %v184_v33, %v168_v31  ;;  %v170_v41 = vld [vmem:[%s845_s6 + $0x78] sm:$0xff] }
  0x25   :  { %387 = vmatpush3.bf16.msra.mxu1 %v222_v20  ;;  %v185_v42 = vld [vmem:[%s850_s11 + $0x70] sm:$0xff]  ;;  %v186_v43 = vld [vmem:[%s850_s11 + $0x78] sm:$0xff]  ;;  %v135_v53 = vld [vmem:[%s843_s4] sm:$0x1]  ;;  %v236_v59 = vsub.s32 0, %v235_v56 }
  0x26   :  { %375 = vmatpush3.bf16.msra.mxu0 %v133_v17  ;;  %388 = vmatprep.subr.bf16.mxu1 %v427_v3  ;;  %v224_v29 = vpack.c.bf16 %v214_v28, %v213_v27  ;;  %v215_v38 = vadd.f32 %v199_v34, %v151_v35  ;;  %v216_v39 = vadd.f32 %v200_v37, %v152_v36  ;;  %v153_v46 = vld [vmem:[%s844_s5 + $0x70] sm:$0xff]  ;;  %v154_v47 = vld [vmem:[%s844_s5 + $0x78] sm:$0xff]  ;;  %v136_v54 = vld [vmem:[%s849_s10] sm:$0x1] }
  0x27   :  { %v201_v44 = vmul.f32 %v185_v42, %v169_v40  ;;  %v202_v48 = vmul.f32 %v186_v43, %v170_v41  ;;  %v137_v55 = vmul.f32 %v136_v54, %v135_v53  ;;  %v134_v57 = vld [vmem:[%s842_s3] sm:$0x1] }
  0x28   :  { %v225_v45 = vpack.c.bf16 %v216_v39, %v215_v38  ;;  %v228_v4 = vld [vmem:[%s847_s8] sm:$0x1]  ;;  %s403_s8 = scalar_lea.vmem %s335_s24, 128 }
  0x29   :  { %377 = vmatmul.mubr.bf16.vlgmr.msra.gmra.mrb[0].mxu0 %v232_v25  ;;  %389 = vmatpush3.bf16.msra.mxu1 %v223_v26  ;;  %v217_v49 = vadd.f32 %v201_v44, %v153_v46  ;;  %v218_v50 = vadd.f32 %v202_v48, %v154_v47  ;;  %v138_v58 = vadd.f32 %v137_v55, %v134_v57  ;;  %v229_v5 = vld [vmem:[%s851_s12] sm:$0x1]  ;;  %p404_p0 = scmp.ne.s32.totalorder %s335_s24, %s403_s8  ;;  %p409_p2 = scmp.lt.s32.totalorder %s403_s8, %s403_s8 }
  0x2a   :  { %390 = vmatprep.subr.bf16.mxu1 %v427_v3  ;;  %v230_v6 = vmul.f32 %v229_v5, %v228_v4  ;;  %v227_v7 = vld [vmem:[%s846_s7] sm:$0x1] }
  0x2b   :  { %v226_v51 = vpack.c.bf16 %v218_v50, %v217_v49  ;;  %p410_p3 = por %p409_p2, %p408_p1 }
  0x2c   :  { %v231_v8 = vadd.f32 %v230_v6, %v227_v7 }
  0x2d   :  { %391 = vmatpush3.bf16.msra.mxu1 %v224_v29  ;;  %p411_p4 = pnand %p410_p3, %p404_p0 }
  0x2e   :  { %392 = vmatprep.subr.bf16.mxu1 %v427_v3  ;;  %v285_v9 = vrot.slane %v231_v8, %v236_v59 }
  0x31   :  { %393 = vmatpush3.bf16.msra.mxu1 %v225_v45 }
  0x32   :  { %394 = vmatprep.subr.bf16.mxu1 %v427_v3  ;;  %v237_v3 = vrot.slane %v138_v58, %v236_v59 }
  0x35   :  { %395 = vmatpush3.bf16.msra.mxu1 %v226_v51 }
  0xfc   :  { %v273_v60 = vpop.f32.mrb[0].mxu0 }
  0xfd   :  { %v274_v61 = vadd.f32 %v273_v60, %v237_v3  ;;  %v378_v62 = vpop.f32.mrb[1].mxu0 }
  0xfe   :  { %v276_v63 = vpop.f32.mrb[2].mxu0 }
  0xff   :  { %v279_v0 = vmax.f32 %v274_v61, 0.0  ;;  %v379_v1 = vpop.f32.mrb[3].mxu0 }
 0x101   :  { %v280_v2 = vpack.c.bf16 %v279_v0, %v279_v0 }
 0x103   :  { %397 = vmatmul.mubr.bf16.vlgmr.msra.gmra.mrb[0].mxu1 %v280_v2 }
 0x1d6   :  { %v321_v10 = vpop.f32.mrb[0].mxu1 }
 0x1d7   :  { %v322_v11 = vadd.f32 %v321_v10, %v285_v9  ;;  %v398_v12 = vpop.f32.mrb[1].mxu1 }
 0x1d8   :  { %v324_v13 = vpop.f32.mrb[2].mxu1 }
 0x1d9   :  { %327 = vst [vmem:[#allocation2] sm:$0xff] %v322_v11  ;;  %v399_v14 = vpop.f32.mrb[3].mxu1 }
 0x1da   :  { %414 = shalt.err (!%p411_p4)
}
 0x1db   :  { %s415_s25 = scalar_lea.hbm %s852_s13, 128 }
 0x1dc   :  { %p416_p5 = scmp.ne.s32.totalorder %s852_s13, %s415_s25  ;;  %p419_p6 = scmp.lt.u32.totalorder %s415_s25, %s852_s13 }
 0x1de   :  { %p421_p7 = pnand %p419_p6, %p416_p5 }
 0x1e0   :  { %424 = shalt.err (!%p421_p7)
}
 0x1e1   :  { %337 = dma.vmem_to_hbm [thread:$0]  %s335_s24, 128, %s852_s13, [#allocation3]  }
 0x1e2   :  { %425 = dma.done.wait [#allocation3], 128  }
 0x1e3   :  { %426 = vsyncadd [#allocation3], 4294967168 }
 0x1e4   :  { %341 = vsyncpa [#allocation3], 1 }

</bundles_post_ra>
